<compile_context>
chip_gen: v6e
topology: v6e:2x2x1
jax: 0.10.0
libtpu: 0.0.40
codegen_flags: <defaults>
</compile_context>

<pallas_src>
import functools

import jax
import jax.numpy as jnp
from jax.experimental import pallas as pl
from jax.experimental.pallas import tpu as pltpu

EPS = 1e-6

_LANE_QUANTUM = 512            # pad N to a multiple of this (lane-dense stores)
_DEFAULT_MAX_TILE = 64 * 1024  # lanes per grid step (fits 32 MiB scoped VMEM on v7x)


# ---------- in-kernel elementwise special functions (args are always >= 1) ----------
def _softplus(x):
    # F.softplus: log(1 + exp(x)), numerically stable form.
    return jnp.maximum(x, 0.0) + jnp.log(1.0 + jnp.exp(-jnp.abs(x)))


def _digamma(x):
    # valid for x >= 1: shift to z = x + 4 >= 5, then asymptotic series.
    # Only used by the edl_digamma branch.
    z = x
    shift = jnp.zeros_like(x)
    for _ in range(4):
        shift = shift + 1.0 / z
        z = z + 1.0
    zi2 = 1.0 / (z * z)
    dg = jnp.log(z) - 0.5 / z - zi2 * (
        1.0 / 12.0 - zi2 * (1.0 / 120.0 - zi2 * (1.0 / 252.0))
    )
    return dg - shift


# ----------------------------- tiling helper (trace time) -----------------------------
def _tiling(n, max_tile):
    nq = ((n + _LANE_QUANTUM - 1) // _LANE_QUANTUM) * _LANE_QUANTUM
    grid = max(1, -(-nq // max_tile))                       # cdiv
    tile = -(-(nq // _LANE_QUANTUM) // grid) * _LANE_QUANTUM
    return tile, grid * tile, grid                          # (tile, n_pad, grid)


# ----------------------------------- kernel -----------------------------------
def _loss_kernel(logits_ref, lab_ref, unc_ref, stats_ref, *,
                 edl_lambda, num_classes, loss_type, n_valid, tile, masked):
    logits = logits_ref[...].astype(jnp.float32)          # (2, T) lane-major
    lab = (lab_ref[...] > 0).astype(jnp.float32)           # (1, T) class-1 indicator
    t = logits.shape[1]

    # evidence / alpha (softplus_evidence)
    evidence = _softplus(logits)                            # (2, T)
    alpha = evidence + 1.0
    a0 = alpha[0:1, :]                                      # (1, T)
    a1 = alpha[1:2, :]
    S = a0 + a1
    inv_S = 1.0 / S

    alpha_wrong = jnp.where(lab > 0.5, a0, a1)              # wrong-class alpha
    alpha_true = S - alpha_wrong

    # --- data term ---
    if loss_type == "edl_mse":
        err = ((1.0 - lab) - a0 * inv_S) ** 2 + (lab - a1 * inv_S) ** 2
        # sum_c alpha_c (S - alpha_c) = 2*a0*a1 for C=2
        var = 2.0 * a0 * a1 * inv_S * inv_S / (S + 1.0)
        data_term = err + var
    elif loss_type == "edl_log":
        data_term = jnp.log(S) - jnp.log(alpha_true)
    else:  # "edl_digamma"
        data_term = _digamma(S) - _digamma(alpha_true)

    # --- KL(Dir([1, a]) || Dir(1,1)) closed form: log(a) - 1 + 1/a ---
    kl_div = jnp.log(alpha_wrong) - 1.0 + 1.0 / alpha_wrong
    loss_row = data_term + edl_lambda * kl_div              # (1, T)

    # --- argmax / match / uncertainty (first-max tie convention -> class 0) ---
    pred = (logits[1:2, :] > logits[0:1, :]).astype(jnp.float32)
    match = jnp.where(pred == lab, 1.0, 0.0)                # (1, T)

    uncertainty = num_classes * inv_S                       # (1, T)
    unc_ref[...] = uncertainty                              # lane-dense store

    total_ev = evidence[0:1, :] + evidence[1:2, :]          # (1, T)

    # mask padded lanes (static: only emitted when padding actually exists)
    if masked:
        i = pl.program_id(0)
        lane = jax.lax.broadcasted_iota(jnp.int32, (1, t), 1)
        valid = (i * tile + lane < n_valid).astype(jnp.float32)
        match = match * valid
        loss_row = loss_row * valid
        total_ev_v = total_ev * valid
        unc_v = uncertainty * valid
    else:
        total_ev_v = total_ev
        unc_v = uncertainty

    # per-tile partial sums ("fail" sums derived by subtraction in the wrapper)
    s_loss = jnp.sum(loss_row, axis=1, keepdims=True)
    s_match = jnp.sum(match, axis=1, keepdims=True)
    s_ev = jnp.sum(total_ev_v, axis=1, keepdims=True)
    s_evm = jnp.sum(total_ev * match, axis=1, keepdims=True)
    s_unc = jnp.sum(unc_v, axis=1, keepdims=True)
    s_uncm = jnp.sum(uncertainty * match, axis=1, keepdims=True)

    # pack into one lane-dense (8, 128) block: row r = partial r (broadcast on lanes)
    sub = jax.lax.broadcasted_iota(jnp.int32, (8, 128), 0)
    stats_ref[...] = jnp.where(sub == 0, s_loss,
                     jnp.where(sub == 1, s_match,
                     jnp.where(sub == 2, s_ev,
                     jnp.where(sub == 3, s_evm,
                     jnp.where(sub == 4, s_unc,
                     jnp.where(sub == 5, s_uncm, 0.0))))))


# ------------------------------ device-side wrapper ------------------------------
@functools.partial(jax.jit, static_argnames=("edl_lambda", "loss_type", "max_tile"))
def _edl_forward(output, y, *, edl_lambda, loss_type, max_tile=_DEFAULT_MAX_TILE):
    n, c = output.shape
    tile, n_pad, grid = _tiling(n, max_tile)

    labels = y.astype(jnp.int32).reshape(1, n)
    x = output                                   # keep native dtype (cast in-kernel)
    if n_pad != n:
        x = jnp.pad(x, ((0, n_pad - n), (0, 0)))
        labels = jnp.pad(labels, ((0, 0), (0, n_pad - n)))
    logits_t = x.T                               # (2, n_pad) lane-major

    kernel = functools.partial(
        _loss_kernel,
        edl_lambda=float(edl_lambda),
        num_classes=float(c),
        loss_type=loss_type,
        n_valid=n,
        tile=tile,
        masked=(n != n_pad))

    itemsize = int(output.dtype.itemsize)
    unc, partials = pl.pallas_call(
        kernel,
        out_shape=(
            jax.ShapeDtypeStruct((1, n_pad), jnp.float32),        # uncertainty
            jax.ShapeDtypeStruct((grid * 8, 128), jnp.float32),   # per-tile partials
        ),
        grid_spec=pltpu.PrefetchScalarGridSpec(
            num_scalar_prefetch=0,
            grid=(grid,),
            in_specs=[pl.BlockSpec((2, tile), lambda i: (0, i)),
                      pl.BlockSpec((1, tile), lambda i: (0, i))],
            out_specs=[pl.BlockSpec((1, tile), lambda i: (0, i)),
                       pl.BlockSpec((8, 128), lambda i: (i, 0))]),
        compiler_params=pltpu.CompilerParams(
            dimension_semantics=("parallel",),
            vmem_limit_bytes=32 * 1024 * 1024,
            allow_input_fusion=(True, True)),
        cost_estimate=pl.CostEstimate(
            flops=40 * n_pad,
            transcendentals=5 * n_pad,
            bytes_accessed=(2 * itemsize + 8) * n_pad),
    )(logits_t, labels)

    # tiny combine of per-tile partials + final stats (still on device, inside jit)
    sums = partials[:, 0].reshape(grid, 8).sum(axis=0)
    loss = sums[0] / n
    n_succ = sums[1]
    n_fail = n - n_succ
    mes = sums[3] / (n_succ + EPS)
    mef = (sums[2] - sums[3]) / (n_fail + EPS)
    mus = jnp.where(n_succ > 0, sums[5] / jnp.maximum(n_succ, 1.0), 0.5)
    muf = jnp.where(n_fail > 0, (sums[4] - sums[5]) / jnp.maximum(n_fail, 1.0), 0.5)
    stats = jnp.stack([loss, mes, mef, mus, muf])

    if n_pad != n:
        unc = unc[:, :n]
    return unc, stats


# ----------------------------------- handler -----------------------------------
class LossHandlerPallas:
    def __init__(self, edl_lambda=0.5, evidence_func="softplus",
                 loss_type="edl_mse", n_steps=100, host_stats=True):
        assert evidence_func == "softplus", "only softplus_evidence implemented"
        # TODO(synk): 'bce'/'mse' torch-criterion branches not translated.
        assert loss_type in ("edl_mse", "edl_log", "edl_digamma")
        self.edl_lambda = float(edl_lambda)
        self.loss_type = loss_type
        self.n_steps = n_steps        # unused by the referenced torch loss funcs (no annealing)
        self.host_stats = host_stats  # False => no per-step device->host sync

    def __call__(self, global_step, output, y, binary_pred=False, is_binary=None):
        if binary_pred:
            # TODO(synk): dynamic-shape boolean gather (batch.is_binary) done eagerly outside the kernel
            output = output[is_binary]
            y = y[is_binary]
        n, c = output.shape
        assert c == 2

        unc, stats = _edl_forward(output, y,
                                  edl_lambda=self.edl_lambda,
                                  loss_type=self.loss_type)
        loss = stats[0]               # device scalar (like a torch tensor)
        if self.host_stats:
            host = jax.device_get(stats[1:5])      # single transfer for all 4 floats
            evidence_tuple = [float(v) for v in host]
        else:
            evidence_tuple = stats[1:5]            # stays on device, no host sync
        # uncertainty returned lane-major (N,); torch returned (N, 1) — consumers reshape if needed
        return loss, evidence_tuple, unc[0]


# --------------------------------- reference ---------------------------------
def _reference(output, y, edl_lambda):
    from jax.scipy.special import gammaln, digamma
    output = output.astype(jnp.float32)
    y_onehot = jax.nn.one_hot(y, 2, dtype=jnp.float32)
    ev = jax.nn.softplus(output)
    alpha = ev + 1.0
    S = alpha.sum(1, keepdims=True)
    err = ((y_onehot - alpha / S) ** 2).sum(1, keepdims=True)
    var = (alpha * (S - alpha) / (S * S * (S + 1.0))).sum(1, keepdims=True)
    kl_alpha = (alpha - 1.0) * (1.0 - y_onehot) + 1.0
    sA = kl_alpha.sum(1, keepdims=True)
    first = gammaln(sA) - gammaln(kl_alpha).sum(1, keepdims=True)
    second = ((kl_alpha - 1.0) * (digamma(kl_alpha) - digamma(sA))).sum(1, keepdims=True)
    kl = first + second
    loss = (err + var + edl_lambda * kl).mean()

    pred = jnp.argmax(output, -1).reshape(-1, 1)
    match = (pred == y.reshape(-1, 1)).astype(jnp.float32)
    unc = 2.0 / S
    tot = ev.sum(1, keepdims=True)
    n_succ = match.sum()
    n_fail = (1.0 - match).sum()
    mes = (tot * match).sum() / (n_succ + EPS)
    mef = (tot * (1.0 - match)).sum() / (n_fail + EPS)
    mus = jnp.where(n_succ > 0, (unc * match).sum() / jnp.maximum(n_succ, 1.0), 0.5)
    muf = jnp.where(n_fail > 0, (unc * (1.0 - match)).sum() / jnp.maximum(n_fail, 1.0), 0.5)
    return loss, [float(mes), float(mef), float(mus), float(muf)], unc


if __name__ == "__main__":
    key = jax.random.PRNGKey(0)

    def check(n, max_tile=_DEFAULT_MAX_TILE, fold=0):
        k1, k2 = jax.random.split(jax.random.fold_in(key, fold))
        output = jax.random.normal(k1, (n, 2), dtype=jnp.float32)
        y = jax.random.randint(k2, (n,), 0, 2, dtype=jnp.int32)
        unc, stats = _edl_forward(output, y, edl_lambda=0.5,
                                  loss_type="edl_mse", max_tile=max_tile)
        jax.block_until_ready(stats)
        loss_ref, ev_ref, unc_r = _reference(output, y, 0.5)
        assert jnp.allclose(stats[0], loss_ref, rtol=2e-3, atol=2e-3), (stats[0], loss_ref)
        assert jnp.allclose(unc.ravel(), unc_r.ravel(), rtol=2e-3, atol=2e-3)
        for a, b in zip(jax.device_get(stats[1:5]), ev_ref):
            assert abs(float(a) - b) <= 2e-3 + 2e-3 * abs(b), (a, b)

    # public handler at a small shape (N=8, C=2)
    N, C = 8, 2
    k1, k2 = jax.random.split(key)
    output = jax.random.normal(k1, (N, C), dtype=jnp.float32)
    y = jax.random.randint(k2, (N,), 0, C, dtype=jnp.int32)

    handler = LossHandlerPallas(edl_lambda=0.5, evidence_func="softplus",
                                loss_type="edl_mse", n_steps=100)
    loss, evidence_tuple, uncertainty = handler(global_step=10, output=output, y=y)
    jax.block_until_ready(loss)
    jax.block_until_ready(uncertainty)

    loss_ref, ev_ref, unc_ref = _reference(output, y, 0.5)
    assert jnp.allclose(loss, loss_ref, rtol=2e-3, atol=2e-3), (loss, loss_ref)
    assert jnp.allclose(uncertainty, unc_ref.ravel(), rtol=2e-3, atol=2e-3)
    for a, b in zip(evidence_tuple, ev_ref):
        assert abs(a - b) <= 2e-3 + 2e-3 * abs(b), (a, b)

    # padded/masked single-tile path, and forced multi-tile "parallel" partials path
    check(1000, fold=1)                    # grid=1, 24 padded lanes masked
    check(1000, max_tile=512, fold=2)      # grid=2, per-tile partial combine

    print("KERNEL_OK")
</pallas_src>

<mosaic_0001>
module attributes {stable_mosaic.version = 11 : i64} {
  func.func @_loss_kernel(%arg0: i32, %arg1: memref<2x512xf32, #tpu.memory_space<vmem>>, %arg2: memref<1x512xi32, #tpu.memory_space<vmem>>, %arg3: memref<1x512xf32, #tpu.memory_space<vmem>>, %arg4: memref<8x128xf32, #tpu.memory_space<vmem>>) attributes {dimension_semantics = [#tpu.dimension_semantics<parallel>], iteration_bounds = array<i64: 1>, scalar_prefetch = 0 : i64, scratch_operands = 0 : i64, tpu.core_type = #tpu.core_type<tc>, window_params = [{transform_indices = @transform_0, window_bounds = array<i64: 2, 512>}, {transform_indices = @transform_1, window_bounds = array<i64: 1, 512>}, {transform_indices = @transform_2, window_bounds = array<i64: 1, 512>}, {transform_indices = @transform_3, window_bounds = array<i64: 8, 128>}]} {
    %c0 = arith.constant 0 : index
    %c0_0 = arith.constant 0 : index
    %0 = vector.load %arg1[%c0, %c0_0] : memref<2x512xf32, #tpu.memory_space<vmem>>, vector<2x512xf32>
    %c0_1 = arith.constant 0 : index
    %c0_2 = arith.constant 0 : index
    %1 = vector.load %arg2[%c0_1, %c0_2] : memref<1x512xi32, #tpu.memory_space<vmem>>, vector<1x512xi32>
    %c0_i32 = arith.constant 0 : i32
    %2 = vector.broadcast %c0_i32 : i32 to vector<1x512xi32>
    %3 = arith.cmpi sgt, %1, %2 : vector<1x512xi32>
    %4 = arith.extui %3 : vector<1x512xi1> to vector<1x512xi32>
    %5 = arith.sitofp %4 : vector<1x512xi32> to vector<1x512xf32>
    %cst = arith.constant 0.000000e+00 : f32
    %6 = vector.broadcast %cst : f32 to vector<2x512xf32>
    %7 = arith.maximumf %0, %6 : vector<2x512xf32>
    %8 = math.absf %0 : vector<2x512xf32>
    %cst_3 = arith.constant 0.000000e+00 : f32
    %9 = vector.broadcast %cst_3 : f32 to vector<2x512xf32>
    %10 = arith.subf %9, %8 : vector<2x512xf32>
    %11 = math.exp %10 : vector<2x512xf32>
    %cst_4 = arith.constant 1.000000e+00 : f32
    %12 = vector.broadcast %cst_4 : f32 to vector<2x512xf32>
    %13 = arith.addf %12, %11 : vector<2x512xf32>
    %14 = math.log %13 : vector<2x512xf32>
    %15 = arith.addf %7, %14 : vector<2x512xf32>
    %cst_5 = arith.constant 1.000000e+00 : f32
    %16 = vector.broadcast %cst_5 : f32 to vector<2x512xf32>
    %17 = arith.addf %15, %16 : vector<2x512xf32>
    %18 = vector.extract_strided_slice %17 {offsets = [0, 0], sizes = [1, 512], strides = [1, 1]} : vector<2x512xf32> to vector<1x512xf32>
    %19 = vector.extract_strided_slice %17 {offsets = [1, 0], sizes = [1, 512], strides = [1, 1]} : vector<2x512xf32> to vector<1x512xf32>
    %20 = arith.addf %18, %19 : vector<1x512xf32>
    %cst_6 = arith.constant 1.000000e+00 : f32
    %21 = vector.broadcast %cst_6 : f32 to vector<1x512xf32>
    %22 = arith.divf %21, %20 : vector<1x512xf32>
    %cst_7 = arith.constant 5.000000e-01 : f32
    %23 = vector.broadcast %cst_7 : f32 to vector<1x512xf32>
    %24 = arith.cmpf ogt, %5, %23 : vector<1x512xf32>
    %25 = arith.select %24, %18, %19 : vector<1x512xi1>, vector<1x512xf32>
    %cst_8 = arith.constant 1.000000e+00 : f32
    %26 = vector.broadcast %cst_8 : f32 to vector<1x512xf32>
    %27 = arith.subf %26, %5 : vector<1x512xf32>
    %28 = arith.mulf %18, %22 : vector<1x512xf32>
    %29 = arith.subf %27, %28 : vector<1x512xf32>
    %30 = arith.mulf %29, %29 : vector<1x512xf32>
    %31 = arith.mulf %19, %22 : vector<1x512xf32>
    %32 = arith.subf %5, %31 : vector<1x512xf32>
    %33 = arith.mulf %32, %32 : vector<1x512xf32>
    %34 = arith.addf %30, %33 : vector<1x512xf32>
    %cst_9 = arith.constant 2.000000e+00 : f32
    %35 = vector.broadcast %cst_9 : f32 to vector<1x512xf32>
    %36 = arith.mulf %35, %18 : vector<1x512xf32>
    %37 = arith.mulf %36, %19 : vector<1x512xf32>
    %38 = arith.mulf %37, %22 : vector<1x512xf32>
    %39 = arith.mulf %38, %22 : vector<1x512xf32>
    %cst_10 = arith.constant 1.000000e+00 : f32
    %40 = vector.broadcast %cst_10 : f32 to vector<1x512xf32>
    %41 = arith.addf %20, %40 : vector<1x512xf32>
    %42 = arith.divf %39, %41 : vector<1x512xf32>
    %43 = arith.addf %34, %42 : vector<1x512xf32>
    %44 = math.log %25 : vector<1x512xf32>
    %cst_11 = arith.constant 1.000000e+00 : f32
    %45 = vector.broadcast %cst_11 : f32 to vector<1x512xf32>
    %46 = arith.subf %44, %45 : vector<1x512xf32>
    %cst_12 = arith.constant 1.000000e+00 : f32
    %47 = vector.broadcast %cst_12 : f32 to vector<1x512xf32>
    %48 = arith.divf %47, %25 : vector<1x512xf32>
    %49 = arith.addf %46, %48 : vector<1x512xf32>
    %cst_13 = arith.constant 5.000000e-01 : f32
    %50 = vector.broadcast %cst_13 : f32 to vector<1x512xf32>
    %51 = arith.mulf %50, %49 : vector<1x512xf32>
    %52 = arith.addf %43, %51 : vector<1x512xf32>
    %53 = vector.extract_strided_slice %0 {offsets = [1, 0], sizes = [1, 512], strides = [1, 1]} : vector<2x512xf32> to vector<1x512xf32>
    %54 = vector.extract_strided_slice %0 {offsets = [0, 0], sizes = [1, 512], strides = [1, 1]} : vector<2x512xf32> to vector<1x512xf32>
    %55 = arith.cmpf ogt, %53, %54 : vector<1x512xf32>
    %56 = arith.extui %55 : vector<1x512xi1> to vector<1x512xi32>
    %57 = arith.sitofp %56 : vector<1x512xi32> to vector<1x512xf32>
    %58 = arith.cmpf oeq, %57, %5 : vector<1x512xf32>
    %cst_14 = arith.constant 1.000000e+00 : f32
    %cst_15 = arith.constant 0.000000e+00 : f32
    %59 = vector.broadcast %cst_14 : f32 to vector<1x512xf32>
    %60 = vector.broadcast %cst_15 : f32 to vector<1x512xf32>
    %61 = arith.select %58, %59, %60 : vector<1x512xi1>, vector<1x512xf32>
    %cst_16 = arith.constant 2.000000e+00 : f32
    %62 = vector.broadcast %cst_16 : f32 to vector<1x512xf32>
    %63 = arith.mulf %62, %22 : vector<1x512xf32>
    %c0_17 = arith.constant 0 : index
    %c0_18 = arith.constant 0 : index
    %64 = vector.load %arg3[%c0_17, %c0_18] : memref<1x512xf32, #tpu.memory_space<vmem>>, vector<1x512xf32>
    tpu.vector_store %arg3[%c0_17, %c0_18], %63 {strides = array<i32>} : memref<1x512xf32, #tpu.memory_space<vmem>>, vector<1x512xf32>,
    %65 = vector.extract_strided_slice %15 {offsets = [0, 0], sizes = [1, 512], strides = [1, 1]} : vector<2x512xf32> to vector<1x512xf32>
    %66 = vector.extract_strided_slice %15 {offsets = [1, 0], sizes = [1, 512], strides = [1, 1]} : vector<2x512xf32> to vector<1x512xf32>
    %67 = arith.addf %65, %66 : vector<1x512xf32>
    %68 = tpu.iota {dimensions = array<i32: 1>} : vector<1x512xi32>
    %c512_i32 = arith.constant 512 : i32
    %69 = arith.muli %arg0, %c512_i32 : i32
    %70 = vector.broadcast %69 : i32 to vector<1x512xi32>
    %71 = arith.addi %70, %68 : vector<1x512xi32>
    %c8_i32 = arith.constant 8 : i32
    %72 = vector.broadcast %c8_i32 : i32 to vector<1x512xi32>
    %73 = arith.cmpi slt, %71, %72 : vector<1x512xi32>
    %74 = arith.extui %73 : vector<1x512xi1> to vector<1x512xi32>
    %75 = arith.sitofp %74 : vector<1x512xi32> to vector<1x512xf32>
    %76 = arith.mulf %61, %75 : vector<1x512xf32>
    %77 = arith.mulf %52, %75 : vector<1x512xf32>
    %78 = arith.mulf %67, %75 : vector<1x512xf32>
    %79 = arith.mulf %63, %75 : vector<1x512xf32>
    %cst_19 = arith.constant dense<0.000000e+00> : vector<1xf32>
    %80 = vector.multi_reduction <add>, %77, %cst_19 [1] : vector<1x512xf32> to vector<1xf32>
    %81 = vector.shape_cast %80 : vector<1xf32> to vector<1x1xf32>
    %cst_20 = arith.constant dense<0.000000e+00> : vector<1xf32>
    %82 = vector.multi_reduction <add>, %76, %cst_20 [1] : vector<1x512xf32> to vector<1xf32>
    %83 = vector.shape_cast %82 : vector<1xf32> to vector<1x1xf32>
    %cst_21 = arith.constant dense<0.000000e+00> : vector<1xf32>
    %84 = vector.multi_reduction <add>, %78, %cst_21 [1] : vector<1x512xf32> to vector<1xf32>
    %85 = vector.shape_cast %84 : vector<1xf32> to vector<1x1xf32>
    %86 = arith.mulf %67, %76 : vector<1x512xf32>
    %cst_22 = arith.constant dense<0.000000e+00> : vector<1xf32>
    %87 = vector.multi_reduction <add>, %86, %cst_22 [1] : vector<1x512xf32> to vector<1xf32>
    %88 = vector.shape_cast %87 : vector<1xf32> to vector<1x1xf32>
    %cst_23 = arith.constant dense<0.000000e+00> : vector<1xf32>
    %89 = vector.multi_reduction <add>, %79, %cst_23 [1] : vector<1x512xf32> to vector<1xf32>
    %90 = vector.shape_cast %89 : vector<1xf32> to vector<1x1xf32>
    %91 = arith.mulf %63, %76 : vector<1x512xf32>
    %cst_24 = arith.constant dense<0.000000e+00> : vector<1xf32>
    %92 = vector.multi_reduction <add>, %91, %cst_24 [1] : vector<1x512xf32> to vector<1xf32>
    %93 = vector.shape_cast %92 : vector<1xf32> to vector<1x1xf32>
    %94 = tpu.iota {dimensions = array<i32: 0>} : vector<8x128xi32>
    %c0_i32_25 = arith.constant 0 : i32
    %95 = vector.broadcast %c0_i32_25 : i32 to vector<8x128xi32>
    %96 = arith.cmpi eq, %94, %95 : vector<8x128xi32>
    %c1_i32 = arith.constant 1 : i32
    %97 = vector.broadcast %c1_i32 : i32 to vector<8x128xi32>
    %98 = arith.cmpi eq, %94, %97 : vector<8x128xi32>
    %c2_i32 = arith.constant 2 : i32
    %99 = vector.broadcast %c2_i32 : i32 to vector<8x128xi32>
    %100 = arith.cmpi eq, %94, %99 : vector<8x128xi32>
    %c3_i32 = arith.constant 3 : i32
    %101 = vector.broadcast %c3_i32 : i32 to vector<8x128xi32>
    %102 = arith.cmpi eq, %94, %101 : vector<8x128xi32>
    %c4_i32 = arith.constant 4 : i32
    %103 = vector.broadcast %c4_i32 : i32 to vector<8x128xi32>
    %104 = arith.cmpi eq, %94, %103 : vector<8x128xi32>
    %c5_i32 = arith.constant 5 : i32
    %105 = vector.broadcast %c5_i32 : i32 to vector<8x128xi32>
    %106 = arith.cmpi eq, %94, %105 : vector<8x128xi32>
    %cst_26 = arith.constant 0.000000e+00 : f32
    %107 = vector.shape_cast %93 : vector<1x1xf32> to vector<1x1xf32>
    %108 = vector.broadcast %107 : vector<1x1xf32> to vector<8x128xf32>
    %109 = vector.broadcast %cst_26 : f32 to vector<8x128xf32>
    %110 = arith.select %106, %108, %109 : vector<8x128xi1>, vector<8x128xf32>
    %111 = vector.shape_cast %90 : vector<1x1xf32> to vector<1x1xf32>
    %112 = vector.broadcast %111 : vector<1x1xf32> to vector<8x128xf32>
    %113 = arith.select %104, %112, %110 : vector<8x128xi1>, vector<8x128xf32>
    %114 = vector.shape_cast %88 : vector<1x1xf32> to vector<1x1xf32>
    %115 = vector.broadcast %114 : vector<1x1xf32> to vector<8x128xf32>
    %116 = arith.select %102, %115, %113 : vector<8x128xi1>, vector<8x128xf32>
    %117 = vector.shape_cast %85 : vector<1x1xf32> to vector<1x1xf32>
    %118 = vector.broadcast %117 : vector<1x1xf32> to vector<8x128xf32>
    %119 = arith.select %100, %118, %116 : vector<8x128xi1>, vector<8x128xf32>
    %120 = vector.shape_cast %83 : vector<1x1xf32> to vector<1x1xf32>
    %121 = vector.broadcast %120 : vector<1x1xf32> to vector<8x128xf32>
    %122 = arith.select %98, %121, %119 : vector<8x128xi1>, vector<8x128xf32>
    %123 = vector.shape_cast %81 : vector<1x1xf32> to vector<1x1xf32>
    %124 = vector.broadcast %123 : vector<1x1xf32> to vector<8x128xf32>
    %125 = arith.select %96, %124, %122 : vector<8x128xi1>, vector<8x128xf32>
    %c0_27 = arith.constant 0 : index
    %c0_28 = arith.constant 0 : index
    %126 = vector.load %arg4[%c0_27, %c0_28] : memref<8x128xf32, #tpu.memory_space<vmem>>, vector<8x128xf32>
    tpu.vector_store %arg4[%c0_27, %c0_28], %125 {strides = array<i32>} : memref<8x128xf32, #tpu.memory_space<vmem>>, vector<8x128xf32>,
    return
  }
  func.func @transform_0(%arg0: i32) -> (i32, i32) {
    %c0_i32 = arith.constant 0 : i32
    %c0_i32_0 = arith.constant 0 : i32
    return %c0_i32, %arg0 : i32, i32
  }
  func.func @transform_1(%arg0: i32) -> (i32, i32) {
    %c0_i32 = arith.constant 0 : i32
    %c0_i32_0 = arith.constant 0 : i32
    return %c0_i32, %arg0 : i32, i32
  }
  func.func @transform_2(%arg0: i32) -> (i32, i32) {
    %c0_i32 = arith.constant 0 : i32
    %c0_i32_0 = arith.constant 0 : i32
    return %c0_i32, %arg0 : i32, i32
  }
  func.func @transform_3(%arg0: i32) -> (i32, i32) {
    %c0_i32 = arith.constant 0 : i32
    %c0_i32_0 = arith.constant 0 : i32
    return %arg0, %c0_i32 : i32, i32
  }
}

</mosaic_0001>

<bundles_post_ra>
// kernel: _edl_forward.2
= control target key start
LH: loop header
LB: loop body
LE: loop exit
PB: predicated region body
PF: predicated region fallthrough
CT: control target
= control target key end

     0   :  { %s758_s0 = inlined_call_operand.hbm [shape: f32[8,2], index: 0, kind: input, shape index: {}]   ;;  %s759_s1 = inlined_call_operand.<no memory space> [shape: f32[], index: 1, kind: input, shape index: {}]   ;;  %s760_s2 = inlined_call_operand.vmem [shape: s32[1,8], index: 2, kind: input, shape index: {}]   ;;  %s761_s3 = inlined_call_operand.<no memory space> [shape: s32[], index: 3, kind: input, shape index: {}]   ;;  %s762_s4 = inlined_call_operand.vmem [shape: f32[1,512], index: 4, kind: output, shape index: {0}]   ;;  %s763_s5 = inlined_call_operand.vmem [shape: f32[8,128], index: 5, kind: output, shape index: {1}]  }
   0x1   :  { %v11_v0 = vstv %s759_s1  ;;  %v12_v1 = vstv %s761_s3 }
   0x2   :  { %13 = vsyncpa [#allocation13], 0  ;;  %s560_s22 = smov [#allocation12]  }
   0x3   :  { %s20_s23 = sshll.u32 %s560_s22, 4  ;;  %s21_s23 = int_to_ptr.vmem [resolvable:$true] %s20_s23 }
   0x4   :  { %s546_s24 = scalar_lea.vmem %s21_s23, 32  ;;  %p551_p1 = scmp.lt.s32.totalorder %s21_s23, %s21_s23 }
   0x5   :  { %p547_p0 = scmp.ne.s32.totalorder %s21_s23, %s546_s24  ;;  %p552_p2 = scmp.lt.s32.totalorder %s546_s24, %s546_s24 }
   0x7   :  { %p553_p3 = por %p552_p2, %p551_p1 }
   0x9   :  { %p554_p4 = pnand %p553_p3, %p547_p0 }
   0xb   :  { %557 = shalt.err (!%p554_p4)
}
   0xc   :  { %23 = dma.hbm_to_vmem [thread:$0]  %s758_s0, 32, %s21_s23, [#allocation13]  }
   0xd   :  { %558 = dma.done.wait [#allocation13], 32  }
   0xe   :  { %559 = vsyncadd [#allocation13], 4294967264  ;;  %v30_v2 = vlaneseq  ;;  %46 = vst [vmem:[#allocation14 + $0x2] sm:$0x3] %v11_v0  ;;  %v29_v5 = vld [vmem:[#allocation12] sm:$0x3] }
   0xf   :  { %50 = vst [vmem:[#allocation14 + $0x4] sm:$0x3] %v11_v0  ;;  %54 = vst [vmem:[#allocation14 + $0x6] sm:$0x3] %v11_v0  ;;  %v55_v6 = vld [vmem:[%s760_s2] sm:$0x1] }
  0x10   :  { %72 = vst [vmem:[#allocation15 + $0x1] sm:$0x1] %v12_v1  ;;  %76 = vst [vmem:[#allocation15 + $0x2] sm:$0x1] %v12_v1  ;;  %v605_v3 = vshrl.u32 %v30_v2, 7  ;;  %v36_v4 = vand.u32 127, %v30_v2 }
  0x11   :  { %80 = vst [vmem:[#allocation15 + $0x3] sm:$0x1] %v12_v1  ;;  %v561_v15 = vmov 1983009808   ;;  %v562_v17 = vmov 857870592  }
  0x12   :  { %vm33_vm0 = vcmp.lt.s32.totalorder %v605_v3, 2  ;;  %vm59_vm1 = vcmp.lt.s32.totalorder %v605_v3, 1  ;;  %vm38_vm2 = vcmp.lt.s32.totalorder %v36_v4, 8  ;;  %v237_v16 = vunpack.c.l.s4 %v561_v15 }
  0x13   :  { %v34_v7 = vsel %vm33_vm0, %v29_v5, %v11_v0  ;;  %v60_v8 = vsel %vm59_vm1, %v55_v6, %v12_v1  ;;  %v178_v18 = vunpack.c.l.s4 %v562_v17  ;;  %v563_v20 = vmov 0.0  }
  0x14   :  { %v39_v9 = vsel %vm38_vm2, %v34_v7, %v11_v0  ;;  %v65_v10 = vsel %vm38_vm2, %v60_v8, %v12_v1  ;;  %v238_v19 = vunpack.c.0.s8 %v237_v16  ;;  %v520_v21 = vsel %vm38_vm2, 1.0, %v563_v20 }
  0x15   :  { %42 = vst [vmem:[#allocation14] sm:$0x3] %v39_v9  ;;  %68 = vst [vmem:[#allocation15] sm:$0x1] %v65_v10  ;;  %v179_v22 = vunpack.c.0.s8 %v178_v18  ;;  %v616_v25 = vcombine.low %v520_v21, %v563_v20  ;;  %v618_v26 = vcombine.low %v563_v20, %v563_v20  ;;  %v564_v37 = vmov 1966171168  }
  0x16   :  { %v241_v27 = vsub.s32 %v238_v19, %v605_v3  ;;  %v105_v38 = vunpack.c.l.s4 %v564_v37  ;;  %v644_v55 = vsub.s32 0, %v605_v3  ;;  %v647_v56 = vsub.s32 2, %v605_v3 }
  0x17   :  { %v182_v30 = vsub.s32 %v179_v22, %v605_v3  ;;  %v650_v58 = vsub.s32 4, %v605_v3  ;;  %vm302_vm6 = vcmask 1040384   ;;  %v655_v61 = vsub.s32 6, %v605_v3 }
  0x18   :  { %v242_v31 = vrot.slane %v616_v25, %v241_v27  ;;  %v249_v32 = vrot.slane %v618_v26, %v241_v27  ;;  %v106_v42 = vunpack.c.0.s8 %v105_v38  ;;  %vm683_vm8 = vcmp.lt.s32.totalorder %v30_v2, 512 }
  0x19   :  { %vm333_vm9 = vcmask 1041409   ;;  %vm475_vm10 = vcmp.eq.s32.totalorder %v605_v3, 5  ;;  %vm474_vm11 = vcmp.eq.s32.totalorder %v605_v3, 4  ;;  %vm473_vm12 = vcmp.eq.s32.totalorder %v605_v3, 3 }
  0x1a   :  { %v627_v36 = vcombine.low %v242_v31, %v249_v32  ;;  %v633_v47 = vsub.s32 %v106_v42, %v605_v3  ;;  %v323_v31 = vsub.s32 5, %v605_v3  ;;  %vm472_vm13 = vcmp.eq.s32.totalorder %v605_v3, 2 }
  0x1b   :  { %vm471_vm14 = vcmp.eq.s32.totalorder %v605_v3, 1  ;;  %vm470_vm15 = vcmp.eq.s32.totalorder %v605_v3, 0 }
  0x1c   :  { %v81_v11 = vld [vmem:[#allocation14] sm:$0xff]  ;;  %v82_v23 = vld [vmem:[#allocation15] sm:$0xf]  ;;  %v251_v39 = vrot.slane %v627_v36, 7 }
  0x1d   :  { %v87_v12 = vand.u32 2147483647, %v81_v11  ;;  %v171_v24 = vrot.slane %v81_v11, 7  ;;  %vm83_vm3 = vcmp.gt.s32.totalorder %v82_v23, 0  ;;  %v86_v41 = vmax.f32 %v81_v11, 0.0 }
  0x1e   :  { %v624_v33 = vsel %vm83_vm3, 1.0, %v563_v20 }
  0x1f   :  { %v88_v13 = vsub.f32 0.0, %v87_v12  ;;  %vm173_vm4 = vcmp.gt.f32.partialorder %v81_v11, %v171_v24  ;;  %v183_v34 = vrot.slane %v624_v33, %v182_v30  ;;  %vm103_vm7 = vcmp.gt.f32.partialorder %v624_v33, 0.5 }
  0x20   :  { %v518_v35 = vsel %vm173_vm4, 1.0, %v563_v20  ;;  %v296_v30 = vsub.s32 3, %v605_v3 }
  0x21   :  { %v89_v14 = vmul.f32 1.442695, %v88_v13  ;;  %vm185_vm5 = vcmp.eq.f32.partialorder %v518_v35, %v183_v34  ;;  %v327_v34 = vsub.s32 7, %v605_v3 }
  0x22   :  { %v186_v40 = vsel %vm185_vm5, 1.0, %v563_v20 }
  0x23   :  { %526 = vpow2.f32 %v89_v14  ;;  %v630_v43 = vmul.f32 %v251_v39, %v186_v40 }
  0x25   :  { %v373_v48 = vrot.slane %v630_v43, 7  ;;  %v320_v39 = vrot.slane %v630_v43, %v296_v30  ;;  %v324_v2 = vrot.slane %v630_v43, %v323_v31 }
  0x27   :  { %v639_v52 = vrot.slane %v373_v48, 2  ;;  %v260_v48 = vrot.slane %v616_v25, %v633_v47 }
  0x30   :  { %v527_v28 = vpop.eup %526 }
  0x31   :  { %v91_v29 = vadd.f32 1.0, %v527_v28 }
  0x33   :  { %528 = vlog2.f32 %v91_v29  ;;  %v677_v29 = vsub.s32 1, %v605_v3 }
  0x35   :  { %v316_v38 = vrot.slane %v630_v43, %v677_v29 }
  0x40   :  { %v529_v44 = vpop.eup %528 }
  0x41   :  { %v93_v45 = vmul.f32 0.6931472, %v529_v44  ;;  %v267_v44 = vrot.slane %v618_v26, %v633_v47  ;;  %v335_v26 = vsel %vm333_vm9, %v320_v39, 0.0 }
  0x43   :  { %v94_v46 = vadd.f32 %v93_v45, %v86_v41  ;;  %v115_v45 = vsub.f32 1.0, %v624_v33 }
  0x45   :  { %v636_v49 = vadd.f32 1.0, %v94_v46  ;;  %v519_v50 = vrot.slane %v94_v46, 9 }
  0x47   :  { %v97_v51 = vrot.slane %v636_v49, 7  ;;  %v206_v53 = vadd.f32 %v519_v50, %v94_v46  ;;  %v110_v54 = vrot.slane %v636_v49, %v633_v47  ;;  %v145_v28 = vmul.f32 2.0, %v636_v49 }
  0x49   :  { %v98_v57 = vrot.slane %v97_v51, 2  ;;  %v376_v59 = vmul.f32 %v639_v52, %v206_v53  ;;  %v279_v60 = vmul.f32 %v627_v36, %v206_v53  ;;  %v112_v62 = vcombine.high %v110_v54, %v110_v54 }
  0x4b   :  { %v100_v63 = vadd.f32 %v98_v57, %v636_v49  ;;  %v381_v0 = vrot.slane %v376_v59, %v644_v55  ;;  %v385_v1 = vrot.slane %v376_v59, %v647_v56  ;;  %v389_v4 = vrot.slane %v376_v59, %v650_v58 }
  0x4c   :  { %v393_v5 = vrot.slane %v376_v59, %v655_v61  ;;  %v347_v6 = vrot.slane %v279_v60, %v644_v55  ;;  %v351_v7 = vrot.slane %v279_v60, %v647_v56  ;;  %v355_v8 = vrot.slane %v279_v60, %v650_v58 }
  0x4d   :  { %530 = vrcp.f32 %v100_v63  ;;  %v398_v9 = vsel %vm302_vm6, %v381_v0, 0.0  ;;  %v399_v10 = vsel %vm302_vm6, %v385_v1, 0.0  ;;  %v401_v11 = vsel %vm302_vm6, %v389_v4, 0.0 }
  0x4e   :  { %v400_v12 = vadd.f32 %v399_v10, %v398_v9  ;;  %v359_v13 = vrot.slane %v279_v60, %v655_v61  ;;  %v364_v14 = vsel %vm302_vm6, %v347_v6, 0.0  ;;  %v403_v15 = vsel %vm302_vm6, %v393_v5, 0.0 }
  0x4f   :  { %v365_v16 = vsel %vm302_vm6, %v351_v7, 0.0  ;;  %v367_v17 = vsel %vm302_vm6, %v355_v8, 0.0  ;;  %v114_v21 = vsel %vm103_vm7, %v110_v54, %v112_v62  ;;  %v149_v22 = vadd.f32 1.0, %v100_v63 }
  0x50   :  { %v402_v18 = vadd.f32 %v401_v11, %v400_v12  ;;  %v366_v19 = vadd.f32 %v365_v16, %v364_v14  ;;  %v369_v20 = vsel %vm302_vm6, %v359_v13, 0.0  ;;  %532 = vlog2.f32 %v114_v21 }
  0x51   :  { %534 = vrcp.f32 %v149_v22  ;;  %v146_v32 = vmul.f32 %v145_v28, %v98_v57  ;;  %v328_v54 = vrot.slane %v630_v43, %v327_v34  ;;  %v334_v57 = vsel %vm333_vm9, %v316_v38, 0.0 }
  0x52   :  { %v404_v23 = vadd.f32 %v403_v15, %v402_v18  ;;  %v368_v24 = vadd.f32 %v367_v17, %v366_v19  ;;  %536 = vrcp.f32 %v114_v21  ;;  %v336_v17 = vadd.f32 %v335_v26, %v334_v57 }
  0x53   :  { %v337_v18 = vsel %vm333_vm9, %v324_v2, 0.0  ;;  %v339_v37 = vsel %vm333_vm9, %v328_v54, 0.0 }
  0x54   :  { %405 = vadd.xlane.f32.xlu1 %v404_v23  ;;  %v370_v27 = vadd.f32 %v369_v20, %v368_v24  ;;  %v338_v34 = vadd.f32 %v337_v18, %v336_v17 }
  0x56   :  { %v340_v2 = vadd.f32 %v339_v37, %v338_v34 }
  0x58   :  { %371 = vadd.xlane.f32.xlu1 %v370_v27 }
  0x5a   :  { %v531_v35 = vpop.eup %530 }
  0x5b   :  { %v187_v40 = vmul.f32 2.0, %v531_v35  ;;  %v116_v41 = vmul.f32 %v531_v35, %v636_v49  ;;  %v129_v42 = vrot.slane %v531_v35, 7  ;;  %v147_v46 = vmul.f32 %v531_v35, %v146_v32 }
  0x5d   :  { %v437_v50 = vmul.f32 %v639_v52, %v187_v40  ;;  %v195_v51 = vrot.slane %v187_v40, %v633_v47  ;;  %v280_v53 = vmul.f32 %v627_v36, %v187_v40  ;;  %v124_v59 = vrot.slane %v116_v41, %v633_v47  ;;  %v533_v1 = vpop.eup %532 }
  0x5e   :  { %v131_v60 = vmul.f32 %v129_v42, %v636_v49  ;;  %v148_v0 = vmul.f32 %v531_v35, %v147_v46  ;;  %v535_v8 = vpop.eup %534  ;;  %v163_v19 = vmul.f32 0.6931472, %v533_v1  ;;  %v268_v40 = vcombine.low %v260_v48, %v267_v44 }
  0x5f   :  { %v442_v62 = vrot.slane %v437_v50, %v644_v55  ;;  %v446_v25 = vrot.slane %v437_v50, %v647_v56  ;;  %v450_v52 = vrot.slane %v437_v50, %v650_v58  ;;  %v454_v63 = vrot.slane %v437_v50, %v655_v61  ;;  %201 = vst.msk [vmem:[%s762_s4] sm:$0xf] %vm683_vm8, %v195_v51 }
  0x60   :  { %v411_v36 = vrot.slane %v280_v53, %v644_v55  ;;  %v415_v43 = vrot.slane %v280_v53, %v647_v56  ;;  %v419_v49 = vrot.slane %v280_v53, %v650_v58  ;;  %v423_v7 = vrot.slane %v280_v53, %v655_v61  ;;  %v537_v61 = vpop.eup %536 }
  0x61   :  { %v459_v4 = vsel %vm302_vm6, %v442_v62, 0.0  ;;  %v460_v5 = vsel %vm302_vm6, %v446_v25, 0.0  ;;  %v462_v6 = vsel %vm302_vm6, %v450_v52, 0.0  ;;  %v464_v58 = vsel %vm302_vm6, %v454_v63, 0.0 }
  0x62   :  { %v461_v9 = vadd.f32 %v460_v5, %v459_v4  ;;  %v428_v10 = vsel %vm302_vm6, %v411_v36, 0.0  ;;  %v429_v11 = vsel %vm302_vm6, %v415_v43, 0.0  ;;  %v431_v12 = vsel %vm302_vm6, %v419_v49, 0.0 }
  0x63   :  { %v430_v13 = vadd.f32 %v429_v11, %v428_v10  ;;  %v126_v14 = vsub.f32 %v115_v45, %v124_v59  ;;  %v139_v15 = vrot.slane %v131_v60, %v633_v47  ;;  %v433_v21 = vsel %vm302_vm6, %v423_v7, 0.0 }
  0x64   :  { %v463_v16 = vadd.f32 %v462_v6, %v461_v9  ;;  %v151_v23 = vmul.f32 %v535_v8, %v148_v0  ;;  %v517_v27 = vadd.f32 -1.0, %v163_v19  ;;  %v275_v46 = vrot.slane %v268_v40, %v633_v47 }
  0x65   :  { %v432_v20 = vadd.f32 %v431_v12, %v430_v13  ;;  %v140_v22 = vcombine.high %v139_v15, %v139_v15  ;;  %v127_v28 = vmul.f32 %v126_v14, %v126_v14 }
  0x66   :  { %v465_v24 = vadd.f32 %v464_v58, %v463_v16  ;;  %v167_v35 = vadd.f32 %v537_v61, %v517_v27  ;;  %v159_v39 = vrot.slane %v151_v23, %v633_v47 }
  0x67   :  { %v142_v31 = vsub.f32 %v624_v33, %v140_v22  ;;  %v434_v32 = vadd.f32 %v433_v21, %v432_v20 }
  0x68   :  { %466 = vadd.xlane.f32.xlu0 %v465_v24  ;;  %v168_v42 = vmul.f32 0.5, %v167_v35 }
  0x69   :  { %v143_v38 = vmul.f32 %v142_v31, %v142_v31 }
  0x6b   :  { %v144_v41 = vadd.f32 %v143_v38, %v127_v28 }
  0x6c   :  { %435 = vadd.xlane.f32.xlu0 %v434_v32 }
  0x6d   :  { %v161_v45 = vadd.f32 %v159_v39, %v144_v41 }
  0x6f   :  { %v169_v50 = vadd.f32 %v168_v42, %v161_v45 }
  0x70   :  { %341 = vadd.xlane.f32.xlu0 %v340_v2 }
  0x71   :  { %v277_v33 = vmul.f32 %v275_v46, %v169_v50 }
  0x73   :  { %v285_v51 = vrot.slane %v277_v33, %v644_v55  ;;  %v289_v53 = vrot.slane %v277_v33, %v677_v29  ;;  %v293_v54 = vrot.slane %v277_v33, %v647_v56  ;;  %v297_v57 = vrot.slane %v277_v33, %v296_v30 }
  0x75   :  { %v303_v44 = vsel %vm302_vm6, %v285_v51, 0.0  ;;  %v304_v48 = vsel %vm302_vm6, %v289_v53, 0.0  ;;  %v306_v26 = vsel %vm302_vm6, %v293_v54, 0.0  ;;  %v308_v47 = vsel %vm302_vm6, %v297_v57, 0.0 }
  0x76   :  { %v305_v59 = vadd.f32 %v304_v48, %v303_v44 }
  0x78   :  { %v307_v60 = vadd.f32 %v306_v26, %v305_v59 }
  0x7a   :  { %v309_v62 = vadd.f32 %v308_v47, %v307_v60 }
  0x7c   :  { %310 = vadd.xlane.f32.xlu1 %v309_v62 }
  0xdd   :  { %v406_v63 = vpop.xlane.xlu1 %405 }
  0xde   :  { %v489_v43 = vrot.slane %v406_v63, %v644_v55 }
  0xe1   :  { %v372_v49 = vpop.xlane.xlu1 %371 }
  0xe2   :  { %v494_v1 = vrot.slane %v372_v49, %v644_v55 }
  0xf1   :  { %v467_v25 = vpop.xlane.xlu0 %466 }
  0xf2   :  { %v479_v52 = vrot.slane %v467_v25, %v644_v55 }
  0xf4   :  { %v480_v36 = vsel %vm475_vm10, %v479_v52, 0.0 }
  0xf5   :  { %v436_v56 = vpop.xlane.xlu0 %435 }
  0xf6   :  { %v484_v30 = vrot.slane %v436_v56, %v644_v55 }
  0xf8   :  { %v485_v0 = vsel %vm474_vm11, %v484_v30, %v480_v36 }
  0xf9   :  { %v342_v4 = vpop.xlane.xlu0 %341  ;;  %v490_v5 = vsel %vm473_vm12, %v489_v43, %v485_v0 }
  0xfa   :  { %v499_v6 = vrot.slane %v342_v4, %v677_v29  ;;  %v495_v7 = vsel %vm472_vm13, %v494_v1, %v490_v5 }
  0xfc   :  { %v500_v10 = vsel %vm471_vm14, %v499_v6, %v495_v7 }
 0x105   :  { %v311_v8 = vpop.xlane.xlu1 %310 }
 0x106   :  { %v504_v9 = vrot.slane %v311_v8, %v644_v55 }
 0x108   :  { %v505_v11 = vsel %vm470_vm15, %v504_v9, %v500_v10 }
 0x109   :  { %506 = vst [vmem:[%s763_s5] sm:$0xff] %v505_v11 }
 0x10a   :  { %515 = vsyncpa [#allocation13], 1 }

</bundles_post_ra>
